<compile_context>
chip_gen: v7x
topology: tpu7x:2x2x1
jax: 0.10.0
libtpu: 0.0.40
codegen_flags: <defaults>
</compile_context>

<pallas_src>
import jax
import jax.numpy as jnp
from jax.experimental import pallas as pl
from jax.experimental.pallas import tpu as pltpu


def _wbce_kernel(x_ref, y_ref, o_ref):
    """Per (TM, L) tile: accumulate column sums (folded to 8 sublane rows)
    of the unweighted BCE-with-logits loss into the resident output block."""
    i = pl.program_id(1)

    @pl.when(i == 0)
    def _():
        o_ref[...] = jnp.zeros_like(o_ref)

    x = x_ref[...].astype(jnp.float32)
    y = y_ref[...].astype(jnp.float32)
    # Numerically stable BCE-with-logits (matches torch):
    #   loss = max(x, 0) - x*y + log1p(exp(-|x|))
    loss = jnp.maximum(x, 0.0) - x * y + jnp.log1p(jnp.exp(-jnp.abs(x)))
    tm, lanes = loss.shape
    # Fold rows in groups of 8 (sublane-tile aligned): pure vreg adds.
    o_ref[...] += jnp.sum(loss.reshape(tm // 8, 8, lanes), axis=0)


def _round_up(x, m):
    return ((x + m - 1) // m) * m


# Benign padding: logit=1e4, target=1  ->  max(x,0) - x*1 + log1p(exp(-x)) == 0
_PAD_LOGIT = 1e4
_PAD_TARGET = 1.0


def weighted_bce_with_logits_loss(logits, targets, weights, *, block_rows=None):
    """logits, targets: (N, C); weights: (C,).  Returns the scalar
    mean(BCEWithLogitsLoss(reduction='none')(logits, targets) * weights)."""
    n, c = logits.shape
    n_elems = n * c
    w = jnp.asarray(weights, dtype=jnp.float32).reshape(-1)

    # ---- choose a lane-dense class layout ---------------------------------
    # Pad the class dim (with zero weight / zero loss) so it is either a
    # multiple of 128 (keep (N, C) layout) or divides 128 (flatten row-major
    # into lane width 128 -- a free reshape for contiguous arrays).
    if c % 128 == 0:
        c_pad = c
    elif c < 128:
        c_pad = 1
        while c_pad < c:
            c_pad *= 2            # power of two <= 128 -> divides 128
    else:
        c_pad = _round_up(c, 128)

    if c_pad != c:
        pc = c_pad - c
        logits = jnp.pad(logits, ((0, 0), (0, pc)), constant_values=_PAD_LOGIT)
        targets = jnp.pad(targets, ((0, 0), (0, pc)), constant_values=_PAD_TARGET)
        w = jnp.pad(w, (0, pc))   # zero-weight the padding classes

    if c_pad % 128 == 0:
        lanes = c_pad
        rows = n
        x2, y2 = logits, targets                  # keep (N, c_pad) layout
        w_row = w.reshape(1, lanes)
    else:                                         # c_pad divides 128: flatten
        lanes = 128
        reps = lanes // c_pad
        total = n * c_pad
        rows = -(-total // lanes)
        pad_t = rows * lanes - total
        xf = logits.reshape(-1)
        yf = targets.reshape(-1)
        if pad_t:
            xf = jnp.concatenate(
                [xf, jnp.full((pad_t,), _PAD_LOGIT, dtype=xf.dtype)])
            yf = jnp.concatenate(
                [yf, jnp.full((pad_t,), _PAD_TARGET, dtype=yf.dtype)])
        x2 = xf.reshape(rows, lanes)
        y2 = yf.reshape(rows, lanes)
        # Lane l holds class (l % c_pad) since c_pad divides 128.
        w_row = jnp.tile(w, reps).reshape(1, lanes)

    # ---- row tiling: ~1 MiB per input block (x2 inputs x2 pipeline bufs) --
    if block_rows is None:
        itemsize = jnp.dtype(x2.dtype).itemsize
        tm = (1 << 20) // (lanes * itemsize)
        tm = max(8, min(tm, 1024))
        tm = (tm // 8) * 8
    else:
        tm = max(8, (block_rows // 8) * 8)

    rows8 = _round_up(rows, 8)
    if tm >= rows8:
        tm = rows8
        num_splits = 1
    else:
        num_splits = 2     # feed both TensorCores on v7x (harmless elsewhere)

    rows_padded = _round_up(rows, num_splits * tm)
    if rows_padded != rows:
        pr = rows_padded - rows
        x2 = jnp.pad(x2, ((0, pr), (0, 0)), constant_values=_PAD_LOGIT)
        y2 = jnp.pad(y2, ((0, pr), (0, 0)), constant_values=_PAD_TARGET)
    tiles_per_split = rows_padded // (num_splits * tm)

    def xy_map(p, i, T=tiles_per_split):
        return (p * T + i, 0)

    partial = pl.pallas_call(
        _wbce_kernel,
        out_shape=jax.ShapeDtypeStruct((num_splits * 8, lanes), jnp.float32),
        grid=(num_splits, tiles_per_split),
        in_specs=[
            pl.BlockSpec((tm, lanes), xy_map),
            pl.BlockSpec((tm, lanes), xy_map),
        ],
        out_specs=pl.BlockSpec((8, lanes), lambda p, i: (p, 0)),
        compiler_params=pltpu.CompilerParams(
            dimension_semantics=("parallel", "arbitrary"),
        ),
    )(x2, y2)

    # Deferred weighting + final reduce + mean (one tiny XLA op).
    return jnp.sum(partial * w_row) / n_elems


def _reference(logits, targets, weights):
    x = logits.astype(jnp.float32)
    y = targets.astype(jnp.float32)
    loss = jnp.maximum(x, 0.0) - x * y + jnp.log1p(jnp.exp(-jnp.abs(x)))
    return jnp.mean(loss * weights.reshape(1, -1).astype(jnp.float32))


if __name__ == "__main__":
    key = jax.random.PRNGKey(0)
    k1, k2, k3, k4, k5, k6 = jax.random.split(key, 6)

    # --- primary case matching the PyTorch module: (N, C) = (8, 16) --------
    N, C = 8, 16
    logits = jax.random.normal(k1, (N, C), dtype=jnp.float32)
    targets = (jax.random.uniform(k2, (N, C)) > 0.5).astype(jnp.float32)
    weights = 0.5 + 0.1 * jnp.arange(C, dtype=jnp.float32)

    loss = weighted_bce_with_logits_loss(logits, targets, weights)
    jax.block_until_ready(loss)
    ref = _reference(logits, targets, weights)
    assert jnp.allclose(loss, ref, atol=1e-5, rtol=1e-5), (loss, ref)

    # --- exercise the multi-tile / 2-way-parallel pipelined path -----------
    N2, C2 = 320, 16
    x2 = jax.random.normal(k3, (N2, C2), dtype=jnp.float32)
    y2 = (jax.random.uniform(k4, (N2, C2)) > 0.5).astype(jnp.float32)
    w2 = 0.5 + jnp.arange(C2, dtype=jnp.float32) / C2
    loss2 = weighted_bce_with_logits_loss(x2, y2, w2, block_rows=8)
    jax.block_until_ready(loss2)
    ref2 = _reference(x2, y2, w2)
    assert jnp.allclose(loss2, ref2, atol=1e-5, rtol=1e-4), (loss2, ref2)

    # --- exercise class padding + bf16 streaming (in-kernel f32 cast) ------
    N3, C3 = 16, 200
    x3 = jax.random.normal(k5, (N3, C3), dtype=jnp.float32).astype(jnp.bfloat16)
    y3 = (jax.random.uniform(k6, (N3, C3)) > 0.5).astype(jnp.bfloat16)
    w3 = 0.5 + jnp.arange(C3, dtype=jnp.float32) / C3
    loss3 = weighted_bce_with_logits_loss(x3, y3, w3)
    jax.block_until_ready(loss3)
    ref3 = _reference(x3, y3, w3)
    assert jnp.allclose(loss3, ref3, atol=1e-5, rtol=1e-4), (loss3, ref3)

    print("KERNEL_OK")
</pallas_src>

<mosaic_0001>
module attributes {stable_mosaic.version = 11 : i64} {
  func.func @_wbce_kernel(%arg0: i32, %arg1: i32, %arg2: memref<8x128xf32, #tpu.memory_space<vmem>>, %arg3: memref<8x128xf32, #tpu.memory_space<vmem>>, %arg4: memref<8x128xf32, #tpu.memory_space<vmem>>) attributes {dimension_semantics = [#tpu.dimension_semantics<parallel>, #tpu.dimension_semantics<arbitrary>], iteration_bounds = array<i64: 1, 1>, scalar_prefetch = 0 : i64, scratch_operands = 0 : i64, tpu.core_type = #tpu.core_type<tc>, window_params = [{transform_indices = @transform_0, window_bounds = array<i64: 8, 128>}, {transform_indices = @transform_1, window_bounds = array<i64: 8, 128>}, {transform_indices = @transform_2, window_bounds = array<i64: 8, 128>}]} {
    %c0_i32 = arith.constant 0 : i32
    %0 = arith.cmpi eq, %arg1, %c0_i32 : i32
    %1 = arith.extui %0 : i1 to i32
    %c0_i32_0 = arith.constant 0 : i32
    %2 = arith.cmpi ne, %1, %c0_i32_0 : i32
    scf.if %2 {
      %cst_10 = arith.constant 0.000000e+00 : f32
      %20 = vector.broadcast %cst_10 : f32 to vector<8x128xf32>
      %c0_11 = arith.constant 0 : index
      %c0_12 = arith.constant 0 : index
      %21 = vector.load %arg4[%c0_11, %c0_12] : memref<8x128xf32, #tpu.memory_space<vmem>>, vector<8x128xf32>
      tpu.vector_store %arg4[%c0_11, %c0_12], %20 {strides = array<i32>} : memref<8x128xf32, #tpu.memory_space<vmem>>, vector<8x128xf32>,
    } else {
    }
    %c0 = arith.constant 0 : index
    %c0_1 = arith.constant 0 : index
    %3 = vector.load %arg2[%c0, %c0_1] : memref<8x128xf32, #tpu.memory_space<vmem>>, vector<8x128xf32>
    %c0_2 = arith.constant 0 : index
    %c0_3 = arith.constant 0 : index
    %4 = vector.load %arg3[%c0_2, %c0_3] : memref<8x128xf32, #tpu.memory_space<vmem>>, vector<8x128xf32>
    %cst = arith.constant 0.000000e+00 : f32
    %5 = vector.broadcast %cst : f32 to vector<8x128xf32>
    %6 = arith.maximumf %3, %5 : vector<8x128xf32>
    %7 = arith.mulf %3, %4 : vector<8x128xf32>
    %8 = arith.subf %6, %7 : vector<8x128xf32>
    %9 = math.absf %3 : vector<8x128xf32>
    %cst_4 = arith.constant 0.000000e+00 : f32
    %10 = vector.broadcast %cst_4 : f32 to vector<8x128xf32>
    %11 = arith.subf %10, %9 : vector<8x128xf32>
    %12 = math.exp %11 : vector<8x128xf32>
    %13 = math.log1p %12 : vector<8x128xf32>
    %14 = arith.addf %8, %13 : vector<8x128xf32>
    %c0_5 = arith.constant 0 : index
    %c0_6 = arith.constant 0 : index
    %15 = vector.load %arg4[%c0_5, %c0_6] : memref<8x128xf32, #tpu.memory_space<vmem>>, vector<8x128xf32>
    %16 = vector.shape_cast %14 : vector<8x128xf32> to vector<1x8x128xf32>
    %cst_7 = arith.constant dense<0.000000e+00> : vector<8x128xf32>
    %17 = vector.multi_reduction <add>, %16, %cst_7 [0] : vector<1x8x128xf32> to vector<8x128xf32>
    %18 = arith.addf %15, %17 : vector<8x128xf32>
    %c0_8 = arith.constant 0 : index
    %c0_9 = arith.constant 0 : index
    %19 = vector.load %arg4[%c0_8, %c0_9] : memref<8x128xf32, #tpu.memory_space<vmem>>, vector<8x128xf32>
    tpu.vector_store %arg4[%c0_8, %c0_9], %18 {strides = array<i32>} : memref<8x128xf32, #tpu.memory_space<vmem>>, vector<8x128xf32>,
    return
  }
  func.func @transform_0(%arg0: i32, %arg1: i32) -> (i32, i32) {
    %c1_i32 = arith.constant 1 : i32
    %0 = arith.muli %arg0, %c1_i32 : i32
    %1 = arith.addi %0, %arg1 : i32
    %c0_i32 = arith.constant 0 : i32
    %c0_i32_0 = arith.constant 0 : i32
    return %1, %c0_i32 : i32, i32
  }
  func.func @transform_1(%arg0: i32, %arg1: i32) -> (i32, i32) {
    %c1_i32 = arith.constant 1 : i32
    %0 = arith.muli %arg0, %c1_i32 : i32
    %1 = arith.addi %0, %arg1 : i32
    %c0_i32 = arith.constant 0 : i32
    %c0_i32_0 = arith.constant 0 : i32
    return %1, %c0_i32 : i32, i32
  }
  func.func @transform_2(%arg0: i32, %arg1: i32) -> (i32, i32) {
    %c0_i32 = arith.constant 0 : i32
    %c0_i32_0 = arith.constant 0 : i32
    return %arg0, %c0_i32 : i32, i32
  }
}

</mosaic_0001>

<bundles_post_ra>
// kernel: tpu_custom_call.1
= control target key start
LH: loop header
LB: loop body
LE: loop exit
PB: predicated region body
PF: predicated region fallthrough
CT: control target
= control target key end

     0   :  { %7 = vsyncpa [#allocation3], 0  ;;  %s222_s0 = inlined_call_operand.hbm [shape: f32[8,128], index: 0, kind: input, shape index: {}]   ;;  %s223_s1 = inlined_call_operand.hbm [shape: f32[8,128], index: 1, kind: input, shape index: {}]   ;;  %s224_s2 = inlined_call_operand.hbm [shape: f32[8,128], index: 2, kind: output, shape index: {}]  }
   0x1   :  { %8 = vsyncpa [#allocation6], 0 }
   0x2   :  { %9 = vsyncpa [#allocation4], 0  ;;  %s168_s9 = smov [#allocation2]   ;;  %s169_s11 = smov [#allocation5]  }
   0x3   :  { %s19_s10 = sshll.u32 %s168_s9, 4  ;;  %s32_s12 = sshll.u32 %s169_s11, 4  ;;  %s20_s10 = int_to_ptr.vmem [resolvable:$true] %s19_s10  ;;  %s33_s12 = int_to_ptr.vmem [resolvable:$true] %s32_s12 }
   0x4   :  { %s96_s15 = scalar_lea.hbm %s222_s0, 128 }
   0x5   :  { %p97_p0 = scmp.ne.s32.totalorder %s222_s0, %s96_s15  ;;  %p100_p1 = scmp.lt.u32.totalorder %s96_s15, %s222_s0 }
   0x7   :  { %p102_p2 = pnand %p100_p1, %p97_p0 }
   0x9   :  { %105 = shalt.err (!%p102_p2)
}
   0xa   :  { %s106_s20 = scalar_lea.vmem %s20_s10, 128  ;;  %p111_p4 = scmp.lt.s32.totalorder %s20_s10, %s20_s10 }
   0xb   :  { %p107_p3 = scmp.ne.s32.totalorder %s20_s10, %s106_s20  ;;  %p112_p5 = scmp.lt.s32.totalorder %s106_s20, %s106_s20 }
   0xd   :  { %p113_p6 = por %p112_p5, %p111_p4 }
   0xf   :  { %p114_p7 = pnand %p113_p6, %p107_p3 }
  0x11   :  { %117 = shalt.err (!%p114_p7)
}
  0x12   :  { %22 = dma.hbm_to_vmem [thread:$0]  %s222_s0, 128, %s20_s10, [#allocation3]  }
  0x13   :  { %s118_s25 = scalar_lea.hbm %s223_s1, 128 }
  0x14   :  { %p119_p8 = scmp.ne.s32.totalorder %s223_s1, %s118_s25  ;;  %p122_p9 = scmp.lt.u32.totalorder %s118_s25, %s223_s1 }
  0x16   :  { %p124_p10 = pnand %p122_p9, %p119_p8 }
  0x18   :  { %127 = shalt.err (!%p124_p10)
}
  0x19   :  { %s128_s30 = scalar_lea.vmem %s33_s12, 128  ;;  %p133_p12 = scmp.lt.s32.totalorder %s33_s12, %s33_s12 }
  0x1a   :  { %p129_p11 = scmp.ne.s32.totalorder %s33_s12, %s128_s30  ;;  %p134_p13 = scmp.lt.s32.totalorder %s128_s30, %s128_s30 }
  0x1c   :  { %p135_p0 = por %p134_p13, %p133_p12 }
  0x1e   :  { %p136_p1 = pnand %p135_p0, %p129_p11 }
  0x20   :  { %139 = shalt.err (!%p136_p1)
}
  0x21   :  { %35 = dma.hbm_to_vmem [thread:$0]  %s223_s1, 128, %s33_s12, [#allocation6]  }
  0x22   :  { %162 = dma.done.wait [#allocation3], 128  }
  0x23   :  { %163 = vsyncadd [#allocation3], 4294967168 }
  0x24   :  { %164 = dma.done.wait [#allocation6], 128  }
  0x25   :  { %165 = vsyncadd [#allocation6], 4294967168  ;;  %v49_v0 = vld [vmem:[#allocation2] sm:$0xff]  ;;  %v50_v7 = vld [vmem:[#allocation5] sm:$0xff]  ;;  %s170_s1 = smov [#allocation7]  }
  0x26   :  { %v54_v1 = vand.u32 2147483647, %v49_v0  ;;  %v51_v9 = vmax.f32 %v49_v0, 0.0  ;;  %v52_v10 = vmul.f32 %v50_v7, %v49_v0  ;;  %s78_s4 = sshll.u32 %s170_s1, 4  ;;  %s79_s4 = int_to_ptr.vmem [resolvable:$true] %s78_s4 }
  0x27   :  { %s140_s5 = scalar_lea.vmem %s79_s4, 128  ;;  %p145_p3 = scmp.lt.s32.totalorder %s79_s4, %s79_s4 }
  0x28   :  { %v55_v2 = vsub.f32 0.0, %v54_v1  ;;  %v53_v14 = vsub.f32 %v51_v9, %v52_v10  ;;  %p141_p2 = scmp.ne.s32.totalorder %s79_s4, %s140_s5  ;;  %p146_p4 = scmp.lt.s32.totalorder %s140_s5, %s140_s5 }
  0x2a   :  { %v56_v3 = vmul.f32 1.442695, %v55_v2  ;;  %p147_p5 = por %p146_p4, %p145_p3 }
  0x2c   :  { %92 = vpow2.f32 %v56_v3  ;;  %p148_p6 = pnand %p147_p5, %p141_p2 }
  0x36   :  { %v93_v4 = vpop.eup %92 }
  0x37   :  { %v58_v5 = vadd.f32 1.0, %v93_v4  ;;  %v61_v6 = vmul.f32 -0.5, %v93_v4  ;;  %v64_v11 = vand.u32 2147483647, %v93_v4 }
  0x39   :  { %94 = vlog2.f32 %v58_v5  ;;  %v62_v8 = vadd.f32 1.0, %v61_v6  ;;  %vm65_vm0 = vcmp.lt.f32.partialorder %v64_v11, 0.0004427343 }
  0x3b   :  { %v63_v12 = vmul.f32 %v93_v4, %v62_v8 }
  0x43   :  { %v95_v13 = vpop.eup %94 }
  0x44   :  { %v60_v15 = vmul.f32 0.6931472, %v95_v13 }
  0x46   :  { %v66_v16 = vsel %vm65_vm0, %v63_v12, %v60_v15 }
  0x47   :  { %v67_v17 = vadd.f32 %v66_v16, %v53_v14 }
  0x49   :  { %71 = vst [vmem:[#allocation7] sm:$0xff] %v67_v17 }
  0x4a   :  { %151 = shalt.err (!%p148_p6)
}
  0x4b   :  { %s152_s8 = scalar_lea.hbm %s224_s2, 128 }
  0x4c   :  { %p153_p7 = scmp.ne.s32.totalorder %s224_s2, %s152_s8  ;;  %p156_p8 = scmp.lt.u32.totalorder %s152_s8, %s224_s2 }
  0x4e   :  { %p158_p9 = pnand %p156_p8, %p153_p7 }
  0x50   :  { %161 = shalt.err (!%p158_p9)
}
  0x51   :  { %81 = dma.vmem_to_hbm [thread:$0]  %s79_s4, 128, %s224_s2, [#allocation4]  }
  0x52   :  { %166 = dma.done.wait [#allocation4], 128  }
  0x53   :  { %167 = vsyncadd [#allocation4], 4294967168 }
  0x54   :  { %85 = vsyncpa [#allocation3], 1 }
  0x55   :  { %86 = vsyncpa [#allocation6], 1 }
  0x56   :  { %87 = vsyncpa [#allocation4], 1 }

</bundles_post_ra>
